<compile_context>
chip_gen: v5e
topology: v5e:2x2
jax: 0.10.0
libtpu: 0.0.40
codegen_flags: <defaults>
</compile_context>

<pallas_src>
import math

import jax
import jax.numpy as jnp
from jax.experimental import pallas as pl
from jax.experimental.pallas import tpu as pltpu


def _spectral_contract_kernel(x_ref, w_ref, o_ref):
    """x: (2B, Cin, Tm) bf16, w: (Cin, Cout, Tm) bf16, o: (2B, Cout, Tm) f32.
    Lane-dense VPU FMA over the static Cin axis; Fourier modes live on lanes."""
    c_in = x_ref.shape[1]
    acc = (x_ref[:, 0:1, :].astype(jnp.float32)
           * w_ref[0:1, :, :].astype(jnp.float32))
    for c in range(1, c_in):
        acc = acc + (x_ref[:, c:c + 1, :].astype(jnp.float32)
                     * w_ref[c:c + 1, :, :].astype(jnp.float32))
    o_ref[...] = acc


def _choose_mode_tile(Mp, two_b, c_in, c_out, budget_bytes=12 << 20):
    """Lane-tile (multiple of 128, divisor of Mp) whose (8,128)-padded,
    double-buffered working set (x + w + out blocks) fits `budget_bytes`.
    Returns (tile_m, vmem_limit_bytes)."""
    ceil8 = lambda n: -(-n // 8) * 8
    bytes_per_lane = (two_b * ceil8(c_in) * 2      # x block, bf16
                      + c_in * ceil8(c_out) * 2    # w block, bf16
                      + two_b * ceil8(c_out) * 4)  # out block, f32
    max_tile = max(128, (budget_bytes // (2 * bytes_per_lane)) // 128 * 128)
    if Mp >= 256:
        # keep >=2 grid steps so v7x can shard the "parallel" axis on both TCs
        max_tile = max(128, min(max_tile, (Mp // 2) // 128 * 128))
    k = Mp // 128
    tile = 128
    for d in range(1, k + 1):
        if k % d == 0 and 128 * d <= max_tile:
            tile = 128 * d
    working = 2 * tile * bytes_per_lane            # double-buffered blocks
    vmem_limit = int(min(32 << 20, max(2 * working, 8 << 20)))
    return tile, vmem_limit


def spectral_contract(x_packed, w_packed, tile_m, vmem_limit):
    """x_packed: (2B, Cin, Mp) bf16; w_packed: (Cin, Cout, Mp) bf16 (mask fused).
    Returns (2B, Cout, Mp) f32. Mp must be a multiple of tile_m (and of 128)."""
    two_b, c_in, Mp = x_packed.shape
    c_out = w_packed.shape[1]
    assert Mp % tile_m == 0
    cost = pl.CostEstimate(
        flops=2 * two_b * c_in * c_out * Mp,
        transcendentals=0,
        bytes_accessed=(two_b * c_in * Mp * 2      # x (bf16)
                        + c_in * c_out * Mp * 2    # w (bf16)
                        + two_b * c_out * Mp * 4), # out (f32)
    )
    return pl.pallas_call(
        _spectral_contract_kernel,
        out_shape=jax.ShapeDtypeStruct((two_b, c_out, Mp), jnp.float32),
        grid=(Mp // tile_m,),
        in_specs=[
            pl.BlockSpec((two_b, c_in, tile_m), lambda i: (0, 0, i)),
            pl.BlockSpec((c_in, c_out, tile_m), lambda i: (0, 0, i)),
        ],
        out_specs=pl.BlockSpec((two_b, c_out, tile_m), lambda i: (0, 0, i)),
        compiler_params=pltpu.CompilerParams(
            dimension_semantics=("parallel",),
            vmem_limit_bytes=vmem_limit),
        cost_estimate=cost,
    )(x_packed, w_packed)


class FactorizedSpectralConvV1Pallas:
    """JAX/Pallas port of FactorizedSpectralConvV1 forward (2-D, n_layers=1,
    indices=0, implementation='factorized' contraction path -> _contract_subnet)."""

    def __init__(self, in_channels, out_channels, n_modes, key,
                 sparsity=0.0, scale=0.1, idx_th=2, var=0.5,
                 fft_norm="backward"):
        self.in_channels = in_channels
        self.out_channels = out_channels
        self.n_modes = tuple(n_modes)
        self.order = len(self.n_modes)
        assert self.order == 2, "2-D spectral conv implemented"
        self.half_n_modes = [m // 2 for m in self.n_modes]
        self.n_weights = 2 ** (self.order - 1)          # n_weights_per_layer * n_layers
        self.fft_norm = fft_norm

        wshape = (in_channels, out_channels, *self.half_n_modes)
        # kaiming_uniform_(a=sqrt(5)) bound (deterministic via JAX PRNG)
        fan_in = out_channels * math.prod(self.half_n_modes)
        bound = math.sqrt(3.0) * math.sqrt(2.0 / (1.0 + 5.0)) / math.sqrt(fan_in)
        keys = jax.random.split(key, 3 * self.n_weights)
        self.weight_real = [
            jax.random.uniform(keys[i], wshape, jnp.float32, -bound, bound)
            for i in range(self.n_weights)
        ]
        self.w_m_real = [
            jax.random.uniform(keys[self.n_weights + i], wshape, jnp.float32,
                               -bound, bound)
            for i in range(self.n_weights)
        ]
        self.scale_list = [scale if i < idx_th else 1.0 for i in range(self.n_weights)]
        self.sparsity_list = [sparsity for _ in range(self.n_weights)]
        # GetSubnetFaster ('train' mode) masks; deterministic noise keys.
        self.weight_mask_real = [
            self._get_subnet_mask(keys[2 * self.n_weights + i], self.w_m_real[i],
                                  self.scale_list[i], self.sparsity_list[i],
                                  i, idx_th, var)
            for i in range(self.n_weights)
        ]

        # --- hoisted, fused, kernel-ready weight packing (static per model) ---
        # modes on the LAST (lane) axis, padded once to a multiple of 128, bf16.
        m0, m1 = self.half_n_modes
        self._M = m0 * m1
        self._Mtot = self.n_weights * self._M
        self._Mp = max(128, -(-self._Mtot // 128) * 128)
        w_flat = [
            (self.weight_real[i] * self.weight_mask_real[i]).reshape(
                in_channels, out_channels, self._M)
            for i in range(self.n_weights)
        ]
        w_cat = jnp.concatenate(w_flat, axis=-1)            # (Cin, Cout, Mtot)
        w_cat = jnp.pad(w_cat, ((0, 0), (0, 0), (0, self._Mp - self._Mtot)))
        self.w_packed = w_cat.astype(jnp.bfloat16)          # (Cin, Cout, Mp) bf16

    @staticmethod
    def _get_subnet_mask(key, scores, scale, sparsity, idx, idx_th, var):
        # GetSubnetFaster.forward; with sparsity=0 the result is noise-independent.
        if idx < idx_th:
            std = jnp.exp(var * scores)
            eps = jax.random.normal(key, scores.shape, scores.dtype) * 0.1
            scores = eps * std + scores
        numel = scores.size
        k = 1 + int(round(0.01 * float(sparsity * 100.0) * (numel - 1)))
        k_val = jnp.sort(scores.reshape(-1))[k - 1]
        return jnp.where(scores < k_val,
                         jnp.zeros_like(scores),
                         jnp.ones_like(scores) * scale)

    def _corner_slices(self, H):
        m0, m1 = self.half_n_modes
        # itertools.product order from the torch code:
        #   i=0 -> [:m0, :m1],  i=1 -> [-m0:, :m1]
        return [(slice(0, m0), slice(0, m1)),
                (slice(H - m0, H), slice(0, m1))]

    def __call__(self, x):
        B, Cin, H, W = x.shape
        m0, m1 = self.half_n_modes
        M, Mtot, Mp = self._M, self._Mtot, self._Mp
        Cout = self.out_channels
        Wf = W // 2 + 1

        x_fft = jnp.fft.rfftn(x.astype(jnp.float32), axes=(-2, -1),
                              norm=self.fft_norm)
        corners = self._corner_slices(H)

        # Corner gather straight into the kernel layout: modes on the lane axis.
        blocks = [x_fft[:, :, sh, sw].reshape(B, Cin, M) for (sh, sw) in corners]
        xc = jnp.concatenate(blocks, axis=-1)                      # (B, Cin, Mtot) c64
        # real/imag packed along the batch axis (real weight => same contraction).
        x_ri = jnp.concatenate([jnp.real(xc), jnp.imag(xc)], 0)    # (2B, Cin, Mtot) f32
        x_packed = jnp.pad(x_ri.astype(jnp.bfloat16),
                           ((0, 0), (0, 0), (0, Mp - Mtot)))       # (2B, Cin, Mp) bf16

        tile_m, vmem_limit = _choose_mode_tile(Mp, 2 * B, Cin, Cout)
        out = spectral_contract(x_packed, self.w_packed, tile_m, vmem_limit)

        o = out[:, :, :Mtot]                                       # (2B, Cout, Mtot)
        o_c = jax.lax.complex(o[:B], o[B:])                        # (B, Cout, Mtot)

        out_fft = jnp.zeros((B, Cout, H, Wf), jnp.complex64)
        for i, (sh, sw) in enumerate(corners):
            blk = o_c[:, :, i * M:(i + 1) * M].reshape(B, Cout, m0, m1)
            out_fft = out_fft.at[:, :, sh, sw].set(blk)

        return jnp.fft.irfftn(out_fft, s=(H, W), axes=(-2, -1), norm=self.fft_norm)

    def reference(self, x, quantized=False):
        # pure-JAX reference of the same forward (for validation).
        # quantized=True feeds the contraction the same bf16-rounded operands the
        # kernel sees (tight check); quantized=False is the full-f32 semantics.
        B, Cin, H, W = x.shape
        x_fft = jnp.fft.rfftn(x.astype(jnp.float32), axes=(-2, -1),
                              norm=self.fft_norm)
        out_fft = jnp.zeros((B, self.out_channels, H, W // 2 + 1), jnp.complex64)
        for i, (sh, sw) in enumerate(self._corner_slices(H)):
            wr = self.weight_real[i] * self.weight_mask_real[i]
            xb = x_fft[:, :, sh, sw]
            if quantized:
                wr = wr.astype(jnp.bfloat16).astype(jnp.float32)
                xb = jax.lax.complex(
                    jnp.real(xb).astype(jnp.bfloat16).astype(jnp.float32),
                    jnp.imag(xb).astype(jnp.bfloat16).astype(jnp.float32))
            blk = jnp.einsum('bchw,cohw->bohw', xb, wr.astype(jnp.complex64))
            out_fft = out_fft.at[:, :, sh, sw].set(blk)
        return jnp.fft.irfftn(out_fft, s=(H, W), axes=(-2, -1), norm=self.fft_norm)


if __name__ == "__main__":
    key = jax.random.PRNGKey(0)
    k_x, k_p = jax.random.split(key)

    B, Cin, Cout, H, W = 2, 4, 4, 16, 16
    n_modes = (8, 8)

    x = jax.random.normal(k_x, (B, Cin, H, W), jnp.float32)
    conv = FactorizedSpectralConvV1Pallas(Cin, Cout, n_modes, k_p)

    y = jax.block_until_ready(conv(x))
    assert y.shape == (B, Cout, H, W)

    # tight check vs a reference fed the same bf16-quantized operands
    y_ref_q = jax.block_until_ready(conv.reference(x, quantized=True))
    assert jnp.allclose(y, y_ref_q, rtol=1e-3, atol=1e-5), "mismatch vs bf16 reference"

    # loose check vs the full-f32 module semantics (only bf16 operand rounding)
    y_ref = jax.block_until_ready(conv.reference(x))
    assert jnp.allclose(y, y_ref, rtol=5e-2, atol=5e-3), "mismatch vs f32 reference"

    print("KERNEL_OK")
</pallas_src>

<mosaic_0001>
module attributes {stable_mosaic.version = 11 : i64} {
  func.func @_spectral_contract_kernel(%arg0: i32, %arg1: memref<4x4x128xbf16, #tpu.memory_space<vmem>>, %arg2: memref<4x4x128xbf16, #tpu.memory_space<vmem>>, %arg3: memref<4x4x128xf32, #tpu.memory_space<vmem>>) attributes {dimension_semantics = [#tpu.dimension_semantics<parallel>], iteration_bounds = array<i64: 1>, scalar_prefetch = 0 : i64, scratch_operands = 0 : i64, tpu.core_type = #tpu.core_type<tc>, window_params = [{transform_indices = @transform_0, window_bounds = array<i64: 4, 4, 128>}, {transform_indices = @transform_1, window_bounds = array<i64: 4, 4, 128>}, {transform_indices = @transform_2, window_bounds = array<i64: 4, 4, 128>}]} {
    %c0 = arith.constant 0 : index
    %c0_0 = arith.constant 0 : index
    %c0_1 = arith.constant 0 : index
    %0 = vector.load %arg1[%c0, %c0_0, %c0_1] : memref<4x4x128xbf16, #tpu.memory_space<vmem>>, vector<4x1x128xbf16>
    %1 = arith.extf %0 : vector<4x1x128xbf16> to vector<4x1x128xf32>
    %c0_2 = arith.constant 0 : index
    %c0_3 = arith.constant 0 : index
    %c0_4 = arith.constant 0 : index
    %2 = vector.load %arg2[%c0_2, %c0_3, %c0_4] : memref<4x4x128xbf16, #tpu.memory_space<vmem>>, vector<1x4x128xbf16>
    %3 = arith.extf %2 : vector<1x4x128xbf16> to vector<1x4x128xf32>
    %4 = vector.broadcast %1 : vector<4x1x128xf32> to vector<4x4x128xf32>
    %5 = vector.broadcast %3 : vector<1x4x128xf32> to vector<4x4x128xf32>
    %6 = arith.mulf %4, %5 : vector<4x4x128xf32>
    %c0_5 = arith.constant 0 : index
    %c1 = arith.constant 1 : index
    %c0_6 = arith.constant 0 : index
    %7 = vector.load %arg1[%c0_5, %c1, %c0_6] : memref<4x4x128xbf16, #tpu.memory_space<vmem>>, vector<4x1x128xbf16>
    %8 = arith.extf %7 : vector<4x1x128xbf16> to vector<4x1x128xf32>
    %c1_7 = arith.constant 1 : index
    %c0_8 = arith.constant 0 : index
    %c0_9 = arith.constant 0 : index
    %9 = vector.load %arg2[%c1_7, %c0_8, %c0_9] : memref<4x4x128xbf16, #tpu.memory_space<vmem>>, vector<1x4x128xbf16>
    %10 = arith.extf %9 : vector<1x4x128xbf16> to vector<1x4x128xf32>
    %11 = vector.broadcast %8 : vector<4x1x128xf32> to vector<4x4x128xf32>
    %12 = vector.broadcast %10 : vector<1x4x128xf32> to vector<4x4x128xf32>
    %13 = arith.mulf %11, %12 : vector<4x4x128xf32>
    %14 = arith.addf %6, %13 : vector<4x4x128xf32>
    %c0_10 = arith.constant 0 : index
    %c2 = arith.constant 2 : index
    %c0_11 = arith.constant 0 : index
    %15 = vector.load %arg1[%c0_10, %c2, %c0_11] : memref<4x4x128xbf16, #tpu.memory_space<vmem>>, vector<4x1x128xbf16>
    %16 = arith.extf %15 : vector<4x1x128xbf16> to vector<4x1x128xf32>
    %c2_12 = arith.constant 2 : index
    %c0_13 = arith.constant 0 : index
    %c0_14 = arith.constant 0 : index
    %17 = vector.load %arg2[%c2_12, %c0_13, %c0_14] : memref<4x4x128xbf16, #tpu.memory_space<vmem>>, vector<1x4x128xbf16>
    %18 = arith.extf %17 : vector<1x4x128xbf16> to vector<1x4x128xf32>
    %19 = vector.broadcast %16 : vector<4x1x128xf32> to vector<4x4x128xf32>
    %20 = vector.broadcast %18 : vector<1x4x128xf32> to vector<4x4x128xf32>
    %21 = arith.mulf %19, %20 : vector<4x4x128xf32>
    %22 = arith.addf %14, %21 : vector<4x4x128xf32>
    %c0_15 = arith.constant 0 : index
    %c3 = arith.constant 3 : index
    %c0_16 = arith.constant 0 : index
    %23 = vector.load %arg1[%c0_15, %c3, %c0_16] : memref<4x4x128xbf16, #tpu.memory_space<vmem>>, vector<4x1x128xbf16>
    %24 = arith.extf %23 : vector<4x1x128xbf16> to vector<4x1x128xf32>
    %c3_17 = arith.constant 3 : index
    %c0_18 = arith.constant 0 : index
    %c0_19 = arith.constant 0 : index
    %25 = vector.load %arg2[%c3_17, %c0_18, %c0_19] : memref<4x4x128xbf16, #tpu.memory_space<vmem>>, vector<1x4x128xbf16>
    %26 = arith.extf %25 : vector<1x4x128xbf16> to vector<1x4x128xf32>
    %27 = vector.broadcast %24 : vector<4x1x128xf32> to vector<4x4x128xf32>
    %28 = vector.broadcast %26 : vector<1x4x128xf32> to vector<4x4x128xf32>
    %29 = arith.mulf %27, %28 : vector<4x4x128xf32>
    %30 = arith.addf %22, %29 : vector<4x4x128xf32>
    %c0_20 = arith.constant 0 : index
    %c0_21 = arith.constant 0 : index
    %c0_22 = arith.constant 0 : index
    %31 = vector.load %arg3[%c0_20, %c0_21, %c0_22] : memref<4x4x128xf32, #tpu.memory_space<vmem>>, vector<4x4x128xf32>
    tpu.vector_store %arg3[%c0_20, %c0_21, %c0_22], %30 {strides = array<i32>} : memref<4x4x128xf32, #tpu.memory_space<vmem>>, vector<4x4x128xf32>,
    return
  }
  func.func @transform_0(%arg0: i32) -> (i32, i32, i32) {
    %c0_i32 = arith.constant 0 : i32
    %c0_i32_0 = arith.constant 0 : i32
    %c0_i32_1 = arith.constant 0 : i32
    return %c0_i32, %c0_i32_0, %arg0 : i32, i32, i32
  }
  func.func @transform_1(%arg0: i32) -> (i32, i32, i32) {
    %c0_i32 = arith.constant 0 : i32
    %c0_i32_0 = arith.constant 0 : i32
    %c0_i32_1 = arith.constant 0 : i32
    return %c0_i32, %c0_i32_0, %arg0 : i32, i32, i32
  }
  func.func @transform_2(%arg0: i32) -> (i32, i32, i32) {
    %c0_i32 = arith.constant 0 : i32
    %c0_i32_0 = arith.constant 0 : i32
    %c0_i32_1 = arith.constant 0 : i32
    return %c0_i32, %c0_i32_0, %arg0 : i32, i32, i32
  }
}

</mosaic_0001>

<bundles_post_ra>
// kernel: tpu_custom_call.1
= control target key start
LH: loop header
LB: loop body
LE: loop exit
PB: predicated region body
PF: predicated region fallthrough
CT: control target
= control target key end

     0   :  { %7 = vsyncpa [#allocation3], 0  ;;  %s255_s0 = inlined_call_operand.hbm [shape: bf16[4,4,128], index: 0, kind: input, shape index: {}]   ;;  %s256_s1 = inlined_call_operand.hbm [shape: bf16[4,4,128], index: 1, kind: input, shape index: {}]   ;;  %s257_s2 = inlined_call_operand.hbm [shape: f32[4,4,128], index: 2, kind: output, shape index: {}]  }
   0x1   :  { %8 = vsyncpa [#allocation6], 0 }
   0x2   :  { %9 = vsyncpa [#allocation4], 0  ;;  %s14_s11 = sshll.u32 %s255_s0, 4  ;;  %s224_s12 = smov [#allocation2]   ;;  %s15_s11 = int_to_ptr.hbm [resolvable:$true] %s14_s11 }
   0x3   :  { %s16_s13 = sshll.u32 %s224_s12, 4  ;;  %s27_s16 = sshll.u32 %s256_s1, 4  ;;  %s17_s13 = int_to_ptr.vmem [resolvable:$true] %s16_s13  ;;  %s28_s16 = int_to_ptr.hbm [resolvable:$true] %s27_s16 }
   0x4   :  { %s225_s17 = smov 32   ;;  %s226_s18 = smov 2  }
   0x5   :  { %22 = dma.hbm_to_vmem [thread:$0]  %s15_s11, 128, %s17_s13, [#allocation3], %s225_s17, %s225_s17, %s226_s18  }
   0x6   :  { %s227_s19 = smov [#allocation5]  }
   0x7   :  { %s29_s20 = sshll.u32 %s227_s19, 4  ;;  %s30_s20 = int_to_ptr.vmem [resolvable:$true] %s29_s20 }
   0x8   :  { %35 = dma.hbm_to_vmem [thread:$0]  %s28_s16, 128, %s30_s20, [#allocation6], %s225_s17, %s225_s17, %s226_s18  }
   0x9   :  { %218 = dma.done.wait [#allocation3], 128  }
   0xa   :  { %219 = vsyncadd [#allocation3], 4294967168 }
   0xb   :  { %220 = dma.done.wait [#allocation6], 128  }
   0xc   :  { %221 = vsyncadd [#allocation6], 4294967168  ;;  %v44_v0 = vld [vmem:[#allocation2] sm:$0x1]  ;;  %v52_v1 = vld [vmem:[#allocation5] sm:$0x3] }
   0xd   :  { %v63_v2 = vld [vmem:[#allocation5 + $0x2] sm:$0x3]  ;;  %v48_v3 = vunpack.c.l.bf16 %v44_v0  ;;  %v53_v4 = vunpack.c.l.bf16 %v52_v1  ;;  %v77_v6 = vld [vmem:[#allocation2] sm:$0x2]  ;;  %v86_v7 = vld [vmem:[#allocation5 + $0x4] sm:$0x3] }
   0xe   :  { %v64_v5 = vunpack.c.l.bf16 %v63_v2  ;;  %v101_v8 = vld [vmem:[#allocation5 + $0x6] sm:$0x3]  ;;  %v81_v9 = vunpack.c.l.bf16 %v77_v6  ;;  %v87_v10 = vunpack.c.l.bf16 %v86_v7  ;;  %v45_v12 = vld [vmem:[#allocation2 + $0x2] sm:$0x1]  ;;  %v78_v13 = vld [vmem:[#allocation2 + $0x2] sm:$0x2] }
   0xf   :  { %v102_v11 = vunpack.c.l.bf16 %v101_v8  ;;  %v46_v14 = vld [vmem:[#allocation2 + $0x4] sm:$0x1]  ;;  %v54_v15 = vperm.slane %v48_v3, 0  ;;  %v65_v16 = vperm.slane %v48_v3, 1  ;;  %v49_v17 = vunpack.c.l.bf16 %v45_v12  ;;  %v79_v19 = vld [vmem:[#allocation2 + $0x4] sm:$0x2] }
  0x10   :  { %v82_v18 = vunpack.c.l.bf16 %v78_v13  ;;  %v88_v20 = vperm.slane %v81_v9, 2  ;;  %v103_v21 = vperm.slane %v81_v9, 3  ;;  %v50_v22 = vunpack.c.l.bf16 %v46_v14  ;;  %v47_v36 = vld [vmem:[#allocation2 + $0x6] sm:$0x1]  ;;  %v80_v37 = vld [vmem:[#allocation2 + $0x6] sm:$0x2] }
  0x11   :  { %v83_v23 = vunpack.c.l.bf16 %v79_v19  ;;  %v58_v24 = vmul.f32 %v54_v15, %v53_v4  ;;  %v69_v25 = vmul.f32 %v65_v16, %v64_v5  ;;  %v55_v26 = vperm.slane %v49_v17, 0  ;;  %s228_s0 = smov [#allocation7]   ;;  %s125_s23 = sshll.u32 %s257_s2, 4  ;;  %s126_s23 = int_to_ptr.hbm [resolvable:$true] %s125_s23 }
  0x12   :  { %v66_v27 = vperm.slane %v49_v17, 1  ;;  %v92_v28 = vmul.f32 %v88_v20, %v87_v10  ;;  %v107_v29 = vmul.f32 %v103_v21, %v102_v11  ;;  %v89_v30 = vperm.slane %v82_v18, 2  ;;  %s123_s1 = sshll.u32 %s228_s0, 4  ;;  %s229_s24 = smov 64   ;;  %s124_s1 = int_to_ptr.vmem [resolvable:$true] %s123_s1 }
  0x13   :  { %v104_v31 = vperm.slane %v82_v18, 3  ;;  %v73_v32 = vadd.f32 %v69_v25, %v58_v24  ;;  %v59_v33 = vmul.f32 %v55_v26, %v53_v4  ;;  %v56_v35 = vperm.slane %v50_v22, 0  ;;  %s230_s25 = smov 4  }
  0x14   :  { %v70_v34 = vmul.f32 %v66_v27, %v64_v5  ;;  %v93_v38 = vmul.f32 %v89_v30, %v87_v10  ;;  %v67_v40 = vperm.slane %v50_v22, 1  ;;  %v90_v41 = vperm.slane %v83_v23, 2 }
  0x15   :  { %v108_v39 = vmul.f32 %v104_v31, %v102_v11  ;;  %v96_v42 = vadd.f32 %v92_v28, %v73_v32  ;;  %v60_v44 = vmul.f32 %v56_v35, %v53_v4  ;;  %v105_v45 = vperm.slane %v83_v23, 3 }
  0x16   :  { %v74_v43 = vadd.f32 %v70_v34, %v59_v33  ;;  %v71_v46 = vmul.f32 %v67_v40, %v64_v5  ;;  %v94_v47 = vmul.f32 %v90_v41, %v87_v10  ;;  %v51_v48 = vunpack.c.l.bf16 %v47_v36 }
  0x17   :  { %v84_v49 = vunpack.c.l.bf16 %v80_v37  ;;  %v111_v50 = vadd.f32 %v107_v29, %v96_v42  ;;  %v109_v52 = vmul.f32 %v105_v45, %v102_v11 }
  0x18   :  { %v97_v51 = vadd.f32 %v93_v38, %v74_v43  ;;  %v75_v53 = vadd.f32 %v71_v46, %v60_v44  ;;  %v57_v54 = vperm.slane %v51_v48, 0  ;;  %v68_v55 = vperm.slane %v51_v48, 1 }
  0x19   :  { %v91_v56 = vperm.slane %v84_v49, 2  ;;  %115 = vst [vmem:[#allocation7] sm:$0xf] %v111_v50  ;;  %v106_v58 = vperm.slane %v84_v49, 3 }
  0x1a   :  { %v112_v57 = vadd.f32 %v108_v39, %v97_v51  ;;  %v98_v59 = vadd.f32 %v94_v47, %v75_v53  ;;  %v61_v60 = vmul.f32 %v57_v54, %v53_v4  ;;  %v72_v61 = vmul.f32 %v68_v55, %v64_v5 }
  0x1b   :  { %v95_v62 = vmul.f32 %v91_v56, %v87_v10  ;;  %v110_v1 = vmul.f32 %v106_v58, %v102_v11 }
  0x1c   :  { %116 = vst [vmem:[#allocation7 + $0x4] sm:$0xf] %v112_v57  ;;  %v113_v63 = vadd.f32 %v109_v52, %v98_v59  ;;  %v76_v0 = vadd.f32 %v72_v61, %v61_v60 }
  0x1e   :  { %117 = vst [vmem:[#allocation7 + $0x8] sm:$0xf] %v113_v63  ;;  %v99_v2 = vadd.f32 %v95_v62, %v76_v0 }
  0x20   :  { %v114_v3 = vadd.f32 %v110_v1, %v99_v2 }
  0x22   :  { %118 = vst [vmem:[#allocation7 + $0xc] sm:$0xf] %v114_v3 }
  0x23   :  { %131 = dma.vmem_to_hbm [thread:$0]  %s124_s1, 256, %s126_s23, [#allocation4], %s229_s24, %s229_s24, %s230_s25  }
  0x24   :  { %222 = dma.done.wait [#allocation4], 256  }
  0x25   :  { %223 = vsyncadd [#allocation4], 4294967040 }
  0x26   :  { %136 = vsyncpa [#allocation3], 1 }
  0x27   :  { %137 = vsyncpa [#allocation6], 1 }
  0x28   :  { %138 = vsyncpa [#allocation4], 1 }

</bundles_post_ra>
